<compile_context>
chip_gen: v7x
topology: tpu7x:2x2x1
jax: 0.10.0
libtpu: 0.0.40
codegen_flags: <defaults>
</compile_context>

<pallas_src>
import functools

import jax
import jax.numpy as jnp
from jax.experimental import pallas as pl
from jax.experimental.pallas import tpu as pltpu

LTS_EMBEDDING_SIZE = 32
INPUT_CHANNELS = 5
HIDDEN_CHANNELS = 64
OUTPUT_CHANNELS = LTS_EMBEDDING_SIZE
EDGE_DIMENSION = 3
NEG_SLOPE = 0.2
NEG_INF = -1e30
C_LANE = 128          # all feature slabs padded to 128 lanes (lane-dense I/O)


def _round_up(x, m):
    return ((x + m - 1) // m) * m


# ---------------------------------------------------------------------------
# Generation-aware hardware configuration + VMEM budgeting
# ---------------------------------------------------------------------------
def _tpu_generation():
    try:
        kind = jax.devices()[0].device_kind.lower()
    except Exception:
        return 0
    for g in (7, 6, 5, 4):
        if "v%d" % g in kind:
            return g
    return 0


def _hw_config():
    g = _tpu_generation()
    # v5e has no bf16 VALU/EUP -> keep the elementwise chain in f32 there.
    cdt = jnp.bfloat16 if (g >= 6 or g == 0) else jnp.float32
    if g in (5, 6):
        # 128 MiB physical VMEM: larger tiles, lift the scoped limit.
        return dict(row_tile=512, k_tile=1024, vmem_limit=100 << 20,
                    compute_dtype=cdt)
    # v7x (64 MiB VMEM / TC), v4 and unknown chips: conservative sizing.
    return dict(row_tile=256, k_tile=512, vmem_limit=48 << 20,
                compute_dtype=cdt)


def _vmem_step_bytes(tile_m, tile_k, cdt_bytes, out_bytes):
    """Rough per-grid-step VMEM estimate for the attention kernel, including
    double-buffered inputs/outputs, scratch and in-kernel intermediates."""
    est = 2 * tile_m * tile_k * 2                      # elog tile (bf16, 2 bufs)
    est += 2 * tile_k * C_LANE * 2                     # h tile (bf16)
    est += 2 * (tile_m + tile_k + C_LANE) * 4          # a_dst / a_src / bias
    est += 2 * tile_m * C_LANE * out_bytes             # output tile
    est += tile_m * C_LANE * 4 + 2 * tile_m * 4        # acc / m / l scratch
    est += 3 * tile_m * tile_k * cdt_bytes             # logits / leaky / p
    return est


def _fit_tiles(row_tile, k_tile, vmem_limit, cdt_bytes, out_bytes):
    budget = int(0.7 * vmem_limit)
    while (_vmem_step_bytes(row_tile, k_tile, cdt_bytes, out_bytes) > budget
           and (row_tile > 64 or k_tile > 256)):
        if row_tile >= k_tile // 2 and row_tile > 64:
            row_tile //= 2
        else:
            k_tile //= 2
    return row_tile, k_tile


def _choose_tiling(n, row_tile, k_tile):
    """Pad the node count and pick the (dst-row tile, src/K tile)."""
    n8 = max(8, _round_up(n, 8))
    if n8 <= k_tile:
        # Whole source axis fits in one K tile.  Split the dst axis in two
        # when possible so the "parallel" grid axis can feed both v7x cores.
        tile_m = min(row_tile, _round_up((n8 + 1) // 2, 8)) if n8 >= 16 else n8
        n_pad = _round_up(n8, tile_m)
        tile_k = n_pad
    else:
        tile_m, tile_k = row_tile, k_tile
        n_pad = _round_up(n8, max(row_tile, k_tile))
    return n_pad, tile_m, tile_k


# ---------------------------------------------------------------------------
# Pallas kernels
# ---------------------------------------------------------------------------
def _proj_kernel(x_ref, w_ref, h_ref):
    """h = x @ W (bf16 MXU), 128-lane padded output."""
    h_ref[...] = jnp.dot(x_ref[...], w_ref[...],
                         preferred_element_type=jnp.float32).astype(h_ref.dtype)


def _gat_attn_kernel(nnz_ref, asrc_ref, adst_ref, elog_ref, h_ref, bias_ref,
                     o_ref, m_sc, l_sc, acc_sc, *, compute_dtype, apply_relu):
    """One (dst tile, src tile) step of a dense single-head GATConv with
    flash-style online softmax.

    nnz_ref  : SMEM (num_m*num_k,) i32  per-tile edge occupancy (scalar prefetch)
    asrc_ref : (1, TK)   f32   per-source attention scalar
    adst_ref : (TM, 1)   f32   per-destination attention scalar
    elog_ref : (TM, TK)  bf16  pre-masked edge logits (non-edge = NEG_INF)
    h_ref    : (TK, 128) bf16  projected source features (lane padded)
    bias_ref : (1, 128)  f32
    o_ref    : (TM, 128) bf16/f32
    scratch  : m_sc/l_sc (TM,1) f32, acc_sc (TM,128) f32
    """
    m = pl.program_id(0)
    k = pl.program_id(1)
    nk = pl.num_programs(1)

    @pl.when(k == 0)
    def _init():
        m_sc[...] = jnp.full_like(m_sc, NEG_INF)
        l_sc[...] = jnp.zeros_like(l_sc)
        acc_sc[...] = jnp.zeros_like(acc_sc)

    # Skip (dst,src) tiles that contain no edges (block-diagonal batches).
    @pl.when(nnz_ref[m * nk + k] > 0)
    def _update():
        cdt = compute_dtype
        logits = (elog_ref[...].astype(cdt)
                  + adst_ref[...].astype(cdt)
                  + asrc_ref[...].astype(cdt))                       # (TM, TK)
        leaky = jnp.where(logits > 0, logits, logits * NEG_SLOPE)
        tile_max = jnp.max(leaky, axis=-1, keepdims=True).astype(jnp.float32)
        m_prev = m_sc[...]
        m_new = jnp.maximum(m_prev, tile_max)
        alpha = jnp.exp(m_prev - m_new)                              # (TM,1) f32
        p = jnp.exp(leaky - m_new.astype(cdt))                       # (TM,TK) cdt
        l_sc[...] = alpha * l_sc[...] + jnp.sum(
            p.astype(jnp.float32), axis=-1, keepdims=True)
        acc_sc[...] = alpha * acc_sc[...] + jnp.dot(
            p.astype(jnp.bfloat16), h_ref[...],
            preferred_element_type=jnp.float32)
        m_sc[...] = m_new

    @pl.when(k == nk - 1)
    def _finalize():
        denom = jnp.maximum(l_sc[...], 1e-12)    # rows with all tiles skipped
        out = acc_sc[...] * pl.reciprocal(denom, approx=False) + bias_ref[...]
        if apply_relu:
            out = jnp.maximum(out, 0.0)
        o_ref[...] = out.astype(o_ref.dtype)


def _pool_kernel(p_ref, x_ref, o_ref):
    """global_mean_pool as a pooling matmul tiled over the node axis."""
    @pl.when(pl.program_id(0) == 0)
    def _():
        o_ref[...] = jnp.zeros_like(o_ref)
    o_ref[...] += jnp.dot(p_ref[...], x_ref[...],
                          preferred_element_type=jnp.float32)


# ---------------------------------------------------------------------------
# Graph glue (plain JAX): pre-masked per-edge scalar logits + tile occupancy
# ---------------------------------------------------------------------------
def build_masked_logits(base, edge_index, edge_attr, v, num_nodes):
    """Scatter per-edge scalar logits into the shared NEG_INF base slab.
    logit = edge_attr @ (W_edge @ att_edge); self loops use the per-dest mean
    edge logit (GATConv fill_value='mean')."""
    # TODO(synk): for very large sparse graphs, build these tiles in-kernel
    # from scalar-prefetched CSR instead of a dense (n_pad, n_pad) slab.
    src, dst = edge_index[0], edge_index[1]
    e = edge_attr @ v                                              # (E,)
    deg = jnp.zeros((num_nodes,), jnp.float32).at[dst].add(1.0)
    esum = jnp.zeros((num_nodes,), jnp.float32).at[dst].add(e)
    loop_e = esum / jnp.maximum(deg, 1.0)

    logits = base.at[dst, src].set(e.astype(jnp.bfloat16))
    idx = jnp.arange(num_nodes)
    logits = logits.at[idx, idx].set(loop_e.astype(jnp.bfloat16))
    return logits


def build_tile_occupancy(edge_index, num_nodes, n_pad, tile_m, tile_k):
    """(num_m*num_k,) int32: 1 where a (dst,src) tile has at least one edge or
    self loop, else 0.  Edge structure is shared by all layers."""
    num_m, num_k = n_pad // tile_m, n_pad // tile_k
    src = edge_index[0].astype(jnp.int32)
    dst = edge_index[1].astype(jnp.int32)
    cnt = jnp.zeros((num_m * num_k,), jnp.int32)
    cnt = cnt.at[(dst // tile_m) * num_k + (src // tile_k)].add(1)
    idx = jnp.arange(num_nodes, dtype=jnp.int32)
    cnt = cnt.at[(idx // tile_m) * num_k + (idx // tile_k)].add(1)
    return (cnt > 0).astype(jnp.int32)


# ---------------------------------------------------------------------------
# pallas_call wrappers
# ---------------------------------------------------------------------------
def gat_layer(x_pad, params, elog, tile_nnz, tile_m, tile_k, cfg, apply_relu,
              out_dtype):
    n_pad, cin_pad = x_pad.shape
    w = params["w"]                                                # (cin, cout)
    cin, cout = w.shape
    cparams = pltpu.CompilerParams(dimension_semantics=("parallel",),
                                   vmem_limit_bytes=cfg["vmem_limit"])

    # ---- projection kernel: h = x @ W (128-lane padded, bf16) --------------
    w_pad = jnp.zeros((cin_pad, C_LANE), jnp.float32).at[:cin, :cout].set(w)
    proj_tile = n_pad
    if n_pad > 2048:                       # decoupled (larger) projection tile
        proj_tile = tile_m
        while proj_tile * 2 <= 2048 and n_pad % (proj_tile * 2) == 0:
            proj_tile *= 2
    h = pl.pallas_call(
        _proj_kernel,
        out_shape=jax.ShapeDtypeStruct((n_pad, C_LANE), jnp.bfloat16),
        grid=(n_pad // proj_tile,),
        in_specs=[
            pl.BlockSpec((proj_tile, cin_pad), lambda i: (i, 0)),
            pl.BlockSpec((cin_pad, C_LANE), lambda i: (0, 0)),
        ],
        out_specs=pl.BlockSpec((proj_tile, C_LANE), lambda i: (i, 0)),
        compiler_params=cparams,
    )(x_pad, w_pad.astype(jnp.bfloat16))

    # Per-node attention scalars (tiny matvecs in plain JAX): a = h @ att.
    att_src = jnp.zeros((C_LANE,), jnp.float32).at[:cout].set(params["att_src"])
    att_dst = jnp.zeros((C_LANE,), jnp.float32).at[:cout].set(params["att_dst"])
    a_src_row = jnp.dot(h, att_src.astype(jnp.bfloat16),
                        preferred_element_type=jnp.float32).reshape(1, n_pad)
    a_dst_col = jnp.dot(h, att_dst.astype(jnp.bfloat16),
                        preferred_element_type=jnp.float32).reshape(n_pad, 1)
    bias_pad = jnp.zeros((1, C_LANE), jnp.float32).at[0, :cout].set(params["bias"])

    # ---- attention kernel: (dst tile, src tile) grid, online softmax -------
    num_m, num_k = n_pad // tile_m, n_pad // tile_k
    kern = functools.partial(_gat_attn_kernel,
                             compute_dtype=cfg["compute_dtype"],
                             apply_relu=apply_relu)
    return pl.pallas_call(
        kern,
        out_shape=jax.ShapeDtypeStruct((n_pad, C_LANE), out_dtype),
        grid_spec=pltpu.PrefetchScalarGridSpec(
            num_scalar_prefetch=1,
            grid=(num_m, num_k),
            in_specs=[
                pl.BlockSpec((1, tile_k), lambda m, k, nnz: (0, k)),       # a_src
                pl.BlockSpec((tile_m, 1), lambda m, k, nnz: (m, 0)),       # a_dst
                pl.BlockSpec((tile_m, tile_k), lambda m, k, nnz: (m, k)),  # elog
                pl.BlockSpec((tile_k, C_LANE), lambda m, k, nnz: (k, 0)),  # h
                pl.BlockSpec((1, C_LANE), lambda m, k, nnz: (0, 0)),       # bias
            ],
            out_specs=pl.BlockSpec((tile_m, C_LANE), lambda m, k, nnz: (m, 0)),
            scratch_shapes=[
                pltpu.VMEM((tile_m, 1), jnp.float32),       # running max
                pltpu.VMEM((tile_m, 1), jnp.float32),       # running denom
                pltpu.VMEM((tile_m, C_LANE), jnp.float32),  # accumulator
            ]),
        compiler_params=pltpu.CompilerParams(
            dimension_semantics=("parallel", "arbitrary"),
            vmem_limit_bytes=cfg["vmem_limit"]),
    )(tile_nnz, a_src_row, a_dst_col, elog, h, bias_pad)


def global_mean_pool(x_pad, batch, num_graphs, num_nodes, tile_k, cfg):
    n_pad, c = x_pad.shape
    g_pad = max(8, _round_up(num_graphs, 8))
    batch_pad = jnp.concatenate(
        [batch.astype(jnp.int32),
         jnp.full((n_pad - num_nodes,), -1, jnp.int32)])
    onehot = (batch_pad[None, :] == jnp.arange(g_pad)[:, None]).astype(jnp.float32)
    counts = jnp.maximum(jnp.sum(onehot, axis=1, keepdims=True), 1.0)
    pool_mat = onehot / counts                                     # (G_pad, n_pad)

    tile_n = tile_k if (n_pad > tile_k and n_pad % tile_k == 0) else n_pad
    pooled = pl.pallas_call(
        _pool_kernel,
        out_shape=jax.ShapeDtypeStruct((g_pad, c), jnp.float32),
        grid=(n_pad // tile_n,),
        in_specs=[
            pl.BlockSpec((g_pad, tile_n), lambda i: (0, i)),
            pl.BlockSpec((tile_n, c), lambda i: (i, 0)),
        ],
        out_specs=pl.BlockSpec((g_pad, c), lambda i: (0, 0)),
        compiler_params=pltpu.CompilerParams(
            dimension_semantics=("arbitrary",),
            vmem_limit_bytes=cfg["vmem_limit"]),
    )(pool_mat, x_pad)
    return pooled[:num_graphs]


# ---------------------------------------------------------------------------
# Parameters
# ---------------------------------------------------------------------------
def _glorot(key, shape, fan_in, fan_out):
    lim = (6.0 / (fan_in + fan_out)) ** 0.5
    return jax.random.uniform(key, shape, jnp.float32, -lim, lim)


def init_gat_params(key, cin, cout, edge_dim=EDGE_DIMENSION):
    k = jax.random.split(key, 5)
    return dict(
        w=_glorot(k[0], (cin, cout), cin, cout),                   # lin_src W^T
        att_src=_glorot(k[1], (cout,), 1, cout),
        att_dst=_glorot(k[2], (cout,), 1, cout),
        att_edge=_glorot(k[3], (cout,), 1, cout),
        w_edge=_glorot(k[4], (edge_dim, cout), edge_dim, cout),    # lin_edge W^T
        bias=jnp.zeros((cout,), jnp.float32),
    )


def init_ltsgnn(key, layer_num):
    keys = jax.random.split(key, 4)
    if layer_num == 1:
        return [init_gat_params(keys[0], INPUT_CHANNELS, OUTPUT_CHANNELS)]
    params = [init_gat_params(keys[0], INPUT_CHANNELS, HIDDEN_CHANNELS)]
    if layer_num >= 3:
        params.append(init_gat_params(keys[1], HIDDEN_CHANNELS, HIDDEN_CHANNELS))
        if layer_num >= 4:
            params.append(init_gat_params(keys[2], HIDDEN_CHANNELS, HIDDEN_CHANNELS))
    params.append(init_gat_params(keys[3], HIDDEN_CHANNELS, OUTPUT_CHANNELS))
    return params


# ---------------------------------------------------------------------------
# Forward
# ---------------------------------------------------------------------------
def ltsgnn_forward(params, layer_num, x, edge_index, edge_attr, batch, num_graphs):
    num_nodes, cin = x.shape
    cfg = _hw_config()
    cdt_bytes = 2 if cfg["compute_dtype"] == jnp.bfloat16 else 4
    row_tile, k_tile = _fit_tiles(cfg["row_tile"], cfg["k_tile"],
                                  cfg["vmem_limit"], cdt_bytes, out_bytes=4)
    n_pad, tile_m, tile_k = _choose_tiling(num_nodes, row_tile, k_tile)

    cin_pad = _round_up(cin, 8)
    x_pad = jnp.zeros((n_pad, cin_pad), jnp.bfloat16).at[:num_nodes, :cin].set(
        x.astype(jnp.bfloat16))

    # Edge structure shared by all layers: NEG_INF base slab + tile occupancy.
    base = jnp.full((n_pad, n_pad), NEG_INF, jnp.bfloat16)
    tile_nnz = build_tile_occupancy(edge_index, num_nodes, n_pad, tile_m, tile_k)

    def layer(xp, p, relu, out_dtype):
        v = p["w_edge"] @ p["att_edge"]                            # (edge_dim,)
        elog = build_masked_logits(base, edge_index, edge_attr, v, num_nodes)
        return gat_layer(xp, p, elog, tile_nnz, tile_m, tile_k, cfg, relu,
                         out_dtype)

    if layer_num == 1:
        x_pad = layer(x_pad, params[0], False, jnp.float32)
    else:
        x_pad = layer(x_pad, params[0], True, jnp.bfloat16)
        if layer_num >= 3:
            x_pad = layer(x_pad, params[1], True, jnp.bfloat16)
            if layer_num >= 4:
                x_pad = layer(x_pad, params[2], True, jnp.bfloat16)
        x_pad = layer(x_pad, params[-1], False, jnp.float32)

    pooled = global_mean_pool(x_pad, batch, num_graphs, num_nodes, tile_k, cfg)
    return pooled[:, :OUTPUT_CHANNELS]


# ---------------------------------------------------------------------------
if __name__ == "__main__":
    key = jax.random.PRNGKey(0)
    k_param, k_x, k_e = jax.random.split(key, 3)

    LAYER_NUM = 2
    NUM_NODES = 8           # two graphs of 4 nodes each
    NUM_GRAPHS = 2

    # Node features (N, 5)
    x = jax.random.normal(k_x, (NUM_NODES, INPUT_CHANNELS), jnp.float32)

    # Directed edges within each graph (no self loops, no duplicates).
    src = jnp.array([0, 1, 2, 3, 1, 2, 4, 5, 6, 7, 5, 6], dtype=jnp.int32)
    dst = jnp.array([1, 2, 3, 0, 0, 1, 5, 6, 7, 4, 4, 5], dtype=jnp.int32)
    edge_index = jnp.stack([src, dst], axis=0)                     # (2, E)
    edge_attr = jax.random.normal(k_e, (src.shape[0], EDGE_DIMENSION), jnp.float32)

    # Graph assignment for global_mean_pool.
    batch = jnp.array([0, 0, 0, 0, 1, 1, 1, 1], dtype=jnp.int32)

    params = init_ltsgnn(k_param, LAYER_NUM)

    out = ltsgnn_forward(params, LAYER_NUM, x, edge_index, edge_attr,
                         batch, NUM_GRAPHS)
    out = jax.block_until_ready(out)
    assert out.shape == (NUM_GRAPHS, OUTPUT_CHANNELS)
    assert bool(jnp.all(jnp.isfinite(out)))
    print("KERNEL_OK")
</pallas_src>

<mosaic_0001>
module attributes {stable_mosaic.version = 11 : i64} {
  func.func @_proj_kernel(%arg0: i32, %arg1: memref<8x8xbf16, #tpu.memory_space<vmem>>, %arg2: memref<8x128xbf16, #tpu.memory_space<vmem>>, %arg3: memref<8x128xbf16, #tpu.memory_space<vmem>>) attributes {dimension_semantics = [#tpu.dimension_semantics<parallel>], iteration_bounds = array<i64: 1>, scalar_prefetch = 0 : i64, scratch_operands = 0 : i64, tpu.core_type = #tpu.core_type<tc>, window_params = [{transform_indices = @transform_0, window_bounds = array<i64: 8, 8>}, {pipeline_mode = #tpu.pipeline_mode<synchronous>, transform_indices = @transform_1, window_bounds = array<i64: 8, 128>}, {transform_indices = @transform_2, window_bounds = array<i64: 8, 128>}]} {
    %c0 = arith.constant 0 : index
    %c0_0 = arith.constant 0 : index
    %0 = vector.load %arg1[%c0, %c0_0] : memref<8x8xbf16, #tpu.memory_space<vmem>>, vector<8x8xbf16>
    %c0_1 = arith.constant 0 : index
    %c0_2 = arith.constant 0 : index
    %1 = vector.load %arg2[%c0_1, %c0_2] : memref<8x128xbf16, #tpu.memory_space<vmem>>, vector<8x128xbf16>
    %cst = arith.constant dense<0.000000e+00> : vector<8x128xf32>
    %2 = tpu.matmul %0, %1, %cst {dimension_numbers = #tpu.dot_dimension_numbers<[1], [0], [0], [1], [0, 0, 1, 1], [], []>} : vector<8x8xbf16>, vector<8x128xbf16>, vector<8x128xf32> -> vector<8x128xf32>
    %3 = arith.truncf %2 : vector<8x128xf32> to vector<8x128xbf16>
    %c0_3 = arith.constant 0 : index
    %c0_4 = arith.constant 0 : index
    %4 = vector.load %arg3[%c0_3, %c0_4] : memref<8x128xbf16, #tpu.memory_space<vmem>>, vector<8x128xbf16>
    tpu.vector_store %arg3[%c0_3, %c0_4], %3 {strides = array<i32>} : memref<8x128xbf16, #tpu.memory_space<vmem>>, vector<8x128xbf16>,
    return
  }
  func.func @transform_0(%arg0: i32) -> (i32, i32) {
    %c0_i32 = arith.constant 0 : i32
    %c0_i32_0 = arith.constant 0 : i32
    return %arg0, %c0_i32 : i32, i32
  }
  func.func @transform_1(%arg0: i32) -> (i32, i32) {
    %c0_i32 = arith.constant 0 : i32
    %c0_i32_0 = arith.constant 0 : i32
    %c0_i32_1 = arith.constant 0 : i32
    return %c0_i32, %c0_i32_0 : i32, i32
  }
  func.func @transform_2(%arg0: i32) -> (i32, i32) {
    %c0_i32 = arith.constant 0 : i32
    %c0_i32_0 = arith.constant 0 : i32
    return %arg0, %c0_i32 : i32, i32
  }
}

</mosaic_0001>

<bundles_post_ra>
// kernel: tpu_custom_call.1
= control target key start
LH: loop header
LB: loop body
LE: loop exit
PB: predicated region body
PF: predicated region fallthrough
CT: control target
= control target key end

     0   :  { %7 = vsyncpa [#allocation3], 0  ;;  %s247_s0 = inlined_call_operand.hbm [shape: bf16[8,8], index: 0, kind: input, shape index: {}]   ;;  %s248_s1 = inlined_call_operand.hbm [shape: bf16[8,128], index: 1, kind: input, shape index: {}]   ;;  %s249_s2 = inlined_call_operand.hbm [shape: bf16[8,128], index: 2, kind: output, shape index: {}]  }
   0x1   :  { %8 = vsyncpa [#allocation6], 0 }
   0x2   :  { %9 = vsyncpa [#allocation4], 0  ;;  %s191_s9 = smov [#allocation2]   ;;  %s192_s11 = smov [#allocation5]  }
   0x3   :  { %s16_s10 = sshll.u32 %s191_s9, 4  ;;  %s26_s12 = sshll.u32 %s192_s11, 4  ;;  %s17_s10 = int_to_ptr.vmem [resolvable:$true] %s16_s10  ;;  %s27_s12 = int_to_ptr.vmem [resolvable:$true] %s26_s12 }
   0x4   :  { %s119_s15 = scalar_lea.hbm %s247_s0, 64 }
   0x5   :  { %p120_p0 = scmp.ne.s32.totalorder %s247_s0, %s119_s15  ;;  %p123_p1 = scmp.lt.u32.totalorder %s119_s15, %s247_s0 }
   0x7   :  { %p125_p2 = pnand %p123_p1, %p120_p0 }
   0x9   :  { %128 = shalt.err (!%p125_p2)
}
   0xa   :  { %s129_s20 = scalar_lea.vmem %s17_s10, 64  ;;  %p134_p4 = scmp.lt.s32.totalorder %s17_s10, %s17_s10 }
   0xb   :  { %p130_p3 = scmp.ne.s32.totalorder %s17_s10, %s129_s20  ;;  %p135_p5 = scmp.lt.s32.totalorder %s129_s20, %s129_s20 }
   0xd   :  { %p136_p6 = por %p135_p5, %p134_p4 }
   0xf   :  { %p137_p7 = pnand %p136_p6, %p130_p3 }
  0x11   :  { %140 = shalt.err (!%p137_p7)
}
  0x12   :  { %19 = dma.hbm_to_vmem [thread:$0]  %s247_s0, 64, %s17_s10, [#allocation3]  }
  0x13   :  { %s141_s25 = scalar_lea.hbm %s248_s1, 64 }
  0x14   :  { %p142_p8 = scmp.ne.s32.totalorder %s248_s1, %s141_s25  ;;  %p145_p9 = scmp.lt.u32.totalorder %s141_s25, %s248_s1 }
  0x16   :  { %p147_p10 = pnand %p145_p9, %p142_p8 }
  0x18   :  { %150 = shalt.err (!%p147_p10)
}
  0x19   :  { %s151_s30 = scalar_lea.vmem %s27_s12, 64  ;;  %p156_p12 = scmp.lt.s32.totalorder %s27_s12, %s27_s12 }
  0x1a   :  { %p152_p11 = scmp.ne.s32.totalorder %s27_s12, %s151_s30  ;;  %p157_p13 = scmp.lt.s32.totalorder %s151_s30, %s151_s30 }
  0x1c   :  { %p158_p0 = por %p157_p13, %p156_p12 }
  0x1e   :  { %p159_p1 = pnand %p158_p0, %p152_p11 }
  0x20   :  { %162 = shalt.err (!%p159_p1)
}
  0x21   :  { %29 = dma.hbm_to_vmem [thread:$0]  %s248_s1, 64, %s27_s12, [#allocation6]  }
  0x22   :  { %185 = dma.done.wait [#allocation3], 64  }
  0x23   :  { %186 = vsyncadd [#allocation3], 4294967232 }
  0x24   :  { %187 = dma.done.wait [#allocation6], 64  }
  0x25   :  { %188 = vsyncadd [#allocation6], 4294967232  ;;  %v193_v0 = vmov 0.0   ;;  %vm194_vm0 = vmmov 0   ;;  %vm43_vm1 = vcmask 1043456   ;;  %vm39_vm2 = vcmask 64512  }
  0x26   :  { %108 = vmatprep.subr.bf16.mxu0 %v193_v0  ;;  %110 = vmatprep.mubr.msk.bf16.mxu0 %vm194_vm0, %v193_v0  ;;  %v38_v1 = vld [vmem:[#allocation5] sm:$0xf]  ;;  %v37_v3 = vld [vmem:[#allocation2] sm:$0xf]  ;;  %s195_s4 = smov [#allocation7]  }
  0x27   :  { %v45_v2 = vsel %vm43_vm1, %v38_v1, 0  ;;  %s95_s5 = sshll.u32 %s195_s4, 4  ;;  %s96_s5 = int_to_ptr.vmem [resolvable:$true] %s95_s5 }
  0x28   :  { %109 = vmatpush3.bf16.msra.mxu0 %v45_v2  ;;  %s163_s1 = scalar_lea.vmem %s96_s5, 64  ;;  %p168_p3 = scmp.lt.s32.totalorder %s96_s5, %s96_s5 }
  0x29   :  { %p164_p2 = scmp.ne.s32.totalorder %s96_s5, %s163_s1  ;;  %p169_p4 = scmp.lt.s32.totalorder %s163_s1, %s163_s1 }
  0x2b   :  { %111 = vmatmul.mubr.msk.bf16.vlgmr.msra.gmra.mrb[0].mxu0 %vm39_vm2, %v37_v3  ;;  %p170_p5 = por %p169_p4, %p168_p3 }
  0x2d   :  { %p171_p6 = pnand %p170_p5, %p164_p2 }
  0xfe   :  { %v81_v4 = vpop.f32.mrb[0].mxu0 }
  0xff   :  { %v87_v5 = vpack.c.bf16 %v81_v4, %v81_v4  ;;  %v112_v6 = vpop.f32.mrb[1].mxu0 }
 0x100   :  { %v84_v7 = vpop.f32.mrb[2].mxu0 }
 0x101   :  { %88 = vst [vmem:[#allocation7] sm:$0xf] %v87_v5  ;;  %v113_v8 = vpop.f32.mrb[3].mxu0 }
 0x102   :  { %174 = shalt.err (!%p171_p6)
}
 0x103   :  { %s175_s8 = scalar_lea.hbm %s249_s2, 64 }
 0x104   :  { %p176_p7 = scmp.ne.s32.totalorder %s249_s2, %s175_s8  ;;  %p179_p8 = scmp.lt.u32.totalorder %s175_s8, %s249_s2 }
 0x106   :  { %p181_p9 = pnand %p179_p8, %p176_p7 }
 0x108   :  { %184 = shalt.err (!%p181_p9)
}
 0x109   :  { %98 = dma.vmem_to_hbm [thread:$0]  %s96_s5, 64, %s249_s2, [#allocation4]  }
 0x10a   :  { %189 = dma.done.wait [#allocation4], 64  }
 0x10b   :  { %190 = vsyncadd [#allocation4], 4294967232 }
 0x10c   :  { %102 = vsyncpa [#allocation3], 1 }
 0x10d   :  { %103 = vsyncpa [#allocation6], 1 }
 0x10e   :  { %104 = vsyncpa [#allocation4], 1 }

</bundles_post_ra>
